<compile_context>
chip_gen: v7x
topology: tpu7x:2x2x1
jax: 0.10.0
libtpu: 0.0.40
codegen_flags: <defaults>
</compile_context>

<pallas_src>
import functools

import jax
import jax.numpy as jnp
from jax.experimental import pallas as pl
from jax.experimental.pallas import tpu as pltpu


# ---------------------------------------------------------------------------
# Tiling helpers
# ---------------------------------------------------------------------------

_MiB = 1024 * 1024


def _round_up(x, m):
    return ((x + m - 1) // m) * m


def _round_down(x, m):
    return (x // m) * m


def _vmem_capacity_bytes():
    try:
        return int(pltpu.get_tpu_info().vmem_capacity_bytes)
    except Exception:  # interpret mode / unknown chip -> conservative default
        return 64 * _MiB


def _target_block_bytes(num_streamed):
    """Byte budget for each big streamed (double-buffered) block.

    Generation-gated: ~8 MiB on v5e/v6e (128 MiB VMEM), 6-8 MiB on v7x
    (64 MiB VMEM).  Leaves >60% of VMEM for residents / scratch / compiler.
    """
    budget = (_vmem_capacity_bytes() * 3) // 8
    per_block = budget // (2 * num_streamed)          # 2x for double buffering
    return int(max(512 * 1024, min(8 * _MiB, per_block)))


# ---------------------------------------------------------------------------
# Kernel 1: global average pool over the flattened spatial axis
# ---------------------------------------------------------------------------

def _pool_kernel(x_ref, mean_ref, acc_ref, *, inv_hw, hw, mask_lanes):
    j = pl.program_id(1)

    @pl.when(j == 0)
    def _():
        acc_ref[...] = jnp.zeros_like(acc_ref)

    xb = x_ref[...].astype(jnp.float32)
    if mask_lanes:  # static: only emitted when HW is not a multiple of TL
        tl = xb.shape[1]
        col = jax.lax.broadcasted_iota(jnp.int32, xb.shape, 1) + j * tl
        xb = jnp.where(col < hw, xb, 0.0)
    acc_ref[...] += jnp.sum(xb, axis=1, keepdims=True)

    @pl.when(j == pl.num_programs(1) - 1)
    def _():
        mean_ref[...] = (acc_ref[...] * inv_hw).astype(mean_ref.dtype)


def _global_avg_pool(x2d):
    """x2d: (rows, HW) -> (rows, 1) float32 per-row means."""
    rows, hw = x2d.shape
    itemsize = jnp.dtype(x2d.dtype).itemsize
    target = _target_block_bytes(num_streamed=1)     # only x is streamed

    # Lane tile: multiple of 128 (or the full extent when HW < 128).
    if hw <= 128:
        tl = hw
    else:
        tl_budget = max(128, _round_down(target // (8 * itemsize), 128))
        tl = int(min(tl_budget, _round_up(hw, 128)))

    # Row tile: multiple of 8; keep >= 2 row blocks so both v7x cores get work.
    if rows <= 8:
        tr = rows
    else:
        tr = max(8, _round_down(target // (tl * itemsize), 8))
        tr = min(tr, _round_up(rows, 8))
        tr = min(tr, max(8, _round_up(pl.cdiv(rows, 2), 8)))

    grid = (pl.cdiv(rows, tr), pl.cdiv(hw, tl))
    mask_lanes = (hw % tl) != 0
    kernel = functools.partial(
        _pool_kernel, inv_hw=1.0 / float(hw), hw=hw, mask_lanes=mask_lanes)

    block_bytes = tr * tl * itemsize
    # double-buffered input blocks + tiny output blocks + accumulator + headroom
    vmem_limit = int(max(16 * _MiB, 2 * block_bytes + 3 * tr * 4 + 4 * _MiB))

    return pl.pallas_call(
        kernel,
        out_shape=jax.ShapeDtypeStruct((rows, 1), jnp.float32),
        grid_spec=pltpu.PrefetchScalarGridSpec(
            num_scalar_prefetch=0,
            grid=grid,
            in_specs=[pl.BlockSpec((tr, tl), lambda i, j: (i, j))],
            out_specs=pl.BlockSpec((tr, 1), lambda i, j: (i, 0)),
            scratch_shapes=[pltpu.VMEM((tr, 1), jnp.float32)],
        ),
        compiler_params=pltpu.CompilerParams(
            dimension_semantics=("parallel", "arbitrary"),
            vmem_limit_bytes=vmem_limit,
        ),
    )(x2d)


# ---------------------------------------------------------------------------
# Kernel 2: fused excite MLP (binary 1x1 convs + RPReLU + sigmoid) + scale
# ---------------------------------------------------------------------------

def _excite_scale_kernel(pooled_ref, w1t_ref, w2_ref, b0_ref, al_ref, b1_ref,
                         x_ref, o_ref):
    # --- excite MLP on this batch's pooled vector (tiny; hidden under x DMA) --
    p = pooled_ref[0]                                              # (C, 1) f32

    # HardBinaryConv 1x1 (C -> mid): value = mean(|w|) per out-chan * sign(w).
    w1t = w1t_ref[...]                                             # (C, mid)
    sc1 = jnp.mean(jnp.abs(w1t), axis=0, keepdims=True)            # (1, mid)
    y = jnp.sum((sc1 * jnp.sign(w1t)) * p, axis=0, keepdims=True)  # (1, mid)

    # RPReLU: bias0 -> per-channel PReLU -> bias1.
    t = y + b0_ref[...]
    y = jnp.where(t >= 0.0, t, al_ref[...] * t) + b1_ref[...]      # (1, mid)

    # HardBinaryConv 1x1 (mid -> C), then sigmoid.
    w2 = w2_ref[...]                                               # (C, mid)
    sc2 = jnp.mean(jnp.abs(w2), axis=1, keepdims=True)             # (C, 1)
    y = jnp.sum((sc2 * jnp.sign(w2)) * y, axis=1, keepdims=True)   # (C, 1)
    s = jax.nn.sigmoid(y).astype(o_ref.dtype)                      # (C, 1)

    # --- scale: out = x * s, broadcast along the lane (spatial) axis ---------
    o_ref[...] = x_ref[...] * s[None]                              # (1, C, TL)


def _excite_scale(x3d, pooled, w1, w2, bias0, alpha, bias1):
    """x3d: (B, C, HW); pooled: (B, C, 1) f32; w1: (mid, C); w2: (C, mid)."""
    B, C, hw = x3d.shape
    mid = w1.shape[0]
    itemsize = jnp.dtype(x3d.dtype).itemsize
    target = _target_block_bytes(num_streamed=2)     # x in + out are streamed

    if hw <= 128:
        tl = hw
    else:
        tl_budget = max(128, _round_down(target // (C * itemsize), 128))
        tl = int(min(tl_budget, _round_up(hw, 128)))
    grid = (B, pl.cdiv(hw, tl))

    w1t = jnp.transpose(w1).astype(jnp.float32)      # (C, mid)
    w2f = w2.astype(jnp.float32)                     # (C, mid)
    b0 = bias0.reshape(1, mid).astype(jnp.float32)
    al = alpha.reshape(1, mid).astype(jnp.float32)
    b1 = bias1.reshape(1, mid).astype(jnp.float32)

    block_bytes = C * tl * itemsize
    residents = B * C * 4 + 2 * C * mid * 4 + 3 * mid * 4
    # double-buffered x in + out blocks + small residents + headroom
    vmem_limit = int(max(16 * _MiB, 4 * block_bytes + residents + 4 * _MiB))

    vmem_full = pl.BlockSpec(memory_space=pltpu.MemorySpace.VMEM)
    return pl.pallas_call(
        _excite_scale_kernel,
        out_shape=jax.ShapeDtypeStruct((B, C, hw), x3d.dtype),
        grid_spec=pltpu.PrefetchScalarGridSpec(
            num_scalar_prefetch=0,
            grid=grid,
            in_specs=[
                pl.BlockSpec((1, C, 1), lambda b, j: (b, 0, 0)),    # pooled
                vmem_full, vmem_full,                               # w1t, w2
                vmem_full, vmem_full, vmem_full,                    # b0, al, b1
                pl.BlockSpec((1, C, tl), lambda b, j: (b, 0, j)),   # x
            ],
            out_specs=pl.BlockSpec((1, C, tl), lambda b, j: (b, 0, j)),
        ),
        compiler_params=pltpu.CompilerParams(
            dimension_semantics=("parallel", "parallel"),
            vmem_limit_bytes=vmem_limit,
        ),
    )(pooled, w1t, w2f, b0, al, b1, x3d)


# ---------------------------------------------------------------------------
# SEBlock forward
# ---------------------------------------------------------------------------

def se_block(x, w1, w2, bias0, alpha, bias1):
    """SEBlock forward.

    x:  (B, C, H, W)
    w1: (mid, C)  squeezed 1x1 weight of the first HardBinaryConv (bias=False)
    w2: (C, mid)  squeezed 1x1 weight of the second HardBinaryConv (bias=False)
    bias0, alpha, bias1: (mid,) RPReLU parameters.
    """
    B, C, H, W = x.shape
    hw = H * W
    pooled = _global_avg_pool(x.reshape(B * C, hw))          # (B*C, 1) f32
    out3d = _excite_scale(x.reshape(B, C, hw), pooled.reshape(B, C, 1),
                          w1, w2, bias0, alpha, bias1)       # (B, C, HW)
    return out3d.reshape(B, C, H, W)


# TODO(synk): torch.utils.checkpoint (with_cp=True) is a training-time memory
# optimization with no inference-forward effect; not translated.


def se_block_ref(x, w1, w2, bias0, alpha, bias1):
    """Pure-JAX reference mirroring the PyTorch forward exactly."""
    hi = jax.lax.Precision.HIGHEST
    y = jnp.mean(x.astype(jnp.float32), axis=(2, 3), keepdims=True)  # (B,C,1,1)
    sc1 = jnp.mean(jnp.abs(w1), axis=1, keepdims=True)               # (mid, 1)
    bw1 = sc1 * jnp.sign(w1)                                         # (mid, C)
    y = jnp.einsum("bcij,oc->boij", y, bw1, precision=hi)            # (B,mid,1,1)
    b0 = bias0.reshape(1, -1, 1, 1)
    al = alpha.reshape(1, -1, 1, 1)
    b1 = bias1.reshape(1, -1, 1, 1)
    t = y + b0
    y = jnp.where(t >= 0, t, al * t) + b1
    sc2 = jnp.mean(jnp.abs(w2), axis=1, keepdims=True)               # (C, 1)
    bw2 = sc2 * jnp.sign(w2)                                         # (C, mid)
    y = jnp.einsum("bmij,cm->bcij", y, bw2, precision=hi)            # (B,C,1,1)
    return x * jax.nn.sigmoid(y).astype(x.dtype)


if __name__ == "__main__":
    key = jax.random.PRNGKey(0)
    B, C, H, W = 2, 32, 16, 16
    reduction = 4
    mid = C // reduction

    kx, kw1, kw2, kb0, kb1 = jax.random.split(key, 5)
    x = jax.random.normal(kx, (B, C, H, W), dtype=jnp.float32)
    w1 = 0.1 * jax.random.normal(kw1, (mid, C), dtype=jnp.float32)
    w2 = 0.1 * jax.random.normal(kw2, (C, mid), dtype=jnp.float32)
    # PyTorch defaults: bias = 0, PReLU alpha = 0.25; use small nonzero biases
    # so the RPReLU path is genuinely exercised.
    bias0 = 0.1 * jax.random.normal(kb0, (mid,), dtype=jnp.float32)
    alpha = jnp.full((mid,), 0.25, dtype=jnp.float32)
    bias1 = 0.1 * jax.random.normal(kb1, (mid,), dtype=jnp.float32)

    out = se_block(x, w1, w2, bias0, alpha, bias1)
    out = jax.block_until_ready(out)

    ref = se_block_ref(x, w1, w2, bias0, alpha, bias1)
    assert out.shape == x.shape
    err = float(jnp.max(jnp.abs(out - ref)))
    assert jnp.allclose(out, ref, atol=2e-5, rtol=2e-5), err

    print("KERNEL_OK")
</pallas_src>

<mosaic_0001>
module attributes {stable_mosaic.version = 11 : i64} {
  func.func @_pool_kernel(%arg0: i32, %arg1: i32, %arg2: memref<32x256xf32, #tpu.memory_space<vmem>>, %arg3: memref<32x1xf32, #tpu.memory_space<vmem>>, %arg4: memref<32x1xf32, #tpu.memory_space<vmem>>) attributes {dimension_semantics = [#tpu.dimension_semantics<parallel>, #tpu.dimension_semantics<arbitrary>], iteration_bounds = array<i64: 2, 1>, scalar_prefetch = 0 : i64, scratch_operands = 1 : i64, tpu.core_type = #tpu.core_type<tc>, window_params = [{transform_indices = @transform_0, window_bounds = array<i64: 32, 256>}, {transform_indices = @transform_1, window_bounds = array<i64: 32, 1>}]} {
    %c0_i32 = arith.constant 0 : i32
    %0 = arith.cmpi eq, %arg1, %c0_i32 : i32
    %1 = arith.extui %0 : i1 to i32
    %c0_i32_0 = arith.constant 0 : i32
    %2 = arith.cmpi ne, %1, %c0_i32_0 : i32
    scf.if %2 {
      %cst_8 = arith.constant 0.000000e+00 : f32
      %12 = vector.broadcast %cst_8 : f32 to vector<32x1xf32>
      %c0_9 = arith.constant 0 : index
      %c0_10 = arith.constant 0 : index
      %13 = vector.load %arg4[%c0_9, %c0_10] : memref<32x1xf32, #tpu.memory_space<vmem>>, vector<32x1xf32>
      tpu.vector_store %arg4[%c0_9, %c0_10], %12 {strides = array<i32>} : memref<32x1xf32, #tpu.memory_space<vmem>>, vector<32x1xf32>,
    } else {
    }
    %c0 = arith.constant 0 : index
    %c0_1 = arith.constant 0 : index
    %3 = vector.load %arg2[%c0, %c0_1] : memref<32x256xf32, #tpu.memory_space<vmem>>, vector<32x256xf32>
    %c0_2 = arith.constant 0 : index
    %c0_3 = arith.constant 0 : index
    %4 = vector.load %arg4[%c0_2, %c0_3] : memref<32x1xf32, #tpu.memory_space<vmem>>, vector<32x1xf32>
    %cst = arith.constant dense<0.000000e+00> : vector<32xf32>
    %5 = vector.multi_reduction <add>, %3, %cst [1] : vector<32x256xf32> to vector<32xf32>
    %6 = vector.shape_cast %5 : vector<32xf32> to vector<32x1xf32>
    %7 = arith.addf %4, %6 : vector<32x1xf32>
    %c0_4 = arith.constant 0 : index
    %c0_5 = arith.constant 0 : index
    %8 = vector.load %arg4[%c0_4, %c0_5] : memref<32x1xf32, #tpu.memory_space<vmem>>, vector<32x1xf32>
    tpu.vector_store %arg4[%c0_4, %c0_5], %7 {strides = array<i32>} : memref<32x1xf32, #tpu.memory_space<vmem>>, vector<32x1xf32>,
    %c0_i32_6 = arith.constant 0 : i32
    %9 = arith.cmpi eq, %arg1, %c0_i32_6 : i32
    %10 = arith.extui %9 : i1 to i32
    %c0_i32_7 = arith.constant 0 : i32
    %11 = arith.cmpi ne, %10, %c0_i32_7 : i32
    scf.if %11 {
      %c0_8 = arith.constant 0 : index
      %c0_9 = arith.constant 0 : index
      %12 = vector.load %arg4[%c0_8, %c0_9] : memref<32x1xf32, #tpu.memory_space<vmem>>, vector<32x1xf32>
      %cst_10 = arith.constant 3.906250e-03 : f32
      %13 = vector.broadcast %cst_10 : f32 to vector<32x1xf32>
      %14 = arith.mulf %12, %13 : vector<32x1xf32>
      %c0_11 = arith.constant 0 : index
      %c0_12 = arith.constant 0 : index
      %15 = vector.load %arg3[%c0_11, %c0_12] : memref<32x1xf32, #tpu.memory_space<vmem>>, vector<32x1xf32>
      tpu.vector_store %arg3[%c0_11, %c0_12], %14 {strides = array<i32>} : memref<32x1xf32, #tpu.memory_space<vmem>>, vector<32x1xf32>,
    } else {
    }
    return
  }
  func.func @transform_0(%arg0: i32, %arg1: i32) -> (i32, i32) {
    %c0_i32 = arith.constant 0 : i32
    return %arg0, %arg1 : i32, i32
  }
  func.func @transform_1(%arg0: i32, %arg1: i32) -> (i32, i32) {
    %c0_i32 = arith.constant 0 : i32
    %c0_i32_0 = arith.constant 0 : i32
    return %arg0, %c0_i32 : i32, i32
  }
}

</mosaic_0001>

<bundles_post_ra>
// kernel: tpu_custom_call.1
= control target key start
LH: loop header
LB: loop body
LE: loop exit
PB: predicated region body
PF: predicated region fallthrough
CT: control target
= control target key end

     0   :  { %6 = vsyncpa [#allocation4], 0  ;;  %s598_s0 = inlined_call_operand.hbm [shape: f32[64,256], index: 0, kind: input, shape index: {}]   ;;  %s599_s1 = inlined_call_operand.vmem [shape: f32[64,1], index: 1, kind: output, shape index: {}]  }
   0x1   :  { %8 = vsyncpa [#allocation4 + $0x1], 0  ;;  %s463_s6 = smov 0   ;;  %s465_s7 = smov 0  }
   0x2   :  { %s467_s8 = smov 0   ;;  %s469_s9 = smov 0  }
   0x3   :  { %s471_s10 = smov 0   ;;  %s473_s11 = smov 0  }
   0x4 LB: > { %s293_s12 = sadd.s32 4294967295, %s447_s11   ;;  %s26_s13 = sadd.s32 1, %s443_s10  ;;  %s447_s11 = sphi %s473_s11, %s14_s11   ;;  %s443_s10 = sphi %s471_s10, %s607_s10   ;;  %s439_s9 = sphi %s469_s9, %s606_s9   ;;  %s435_s8 = sphi %s467_s8, %s605_s8   ;;  %s431_s7 = sphi %s465_s7, %s604_s7   ;;  %s427_s6 = sphi %s463_s6, %s603_s6  }
   0x5   : > { %p28_p0 = scmp.ge.s32.totalorder %s26_s13, 2  ;;  %s35_s14 = sadd.s32 1, %s435_s8 }
   0x6   : > { %p42_p1 = scmp.ne.s32.totalorder %s435_s8, %s431_s7  ;;  %p43_p2 = scmp.eq.s32.totalorder %s447_s11, 0 }
   0x7   : > { %s609_s13 = smov (%p28_p0, %s26_s13), 0  ;;  %p48_p4 = scmp.ne.s32.totalorder %s431_s7, %s427_s6 }
   0x8   : > { %p499_p3 = por %p43_p2, %p42_p1  ;;  %s30_s16 = ssub.s32 %s443_s10, %s609_s13 }
   0x9   : > { %p49_p5 = scmp.eq.s32.totalorder %s293_s12, 0  ;;  %p33_p6 = scmp.eq.s32.totalorder %s30_s16, 0 }
   0xa   : > { %p315_p8 = scmp.lt.s32.totalorder %s447_s11, 2  ;;  %s98_s19 = sand.u32 1, %s435_s8  }
   0xb   : > { %p506_p7 = por %p49_p5, %p48_p4  ;;  %s308_s20 = sshll.u32 %s443_s10, 10 }
   0xc   : > { %s512_s18 = scalar_select %p33_p6, %s435_s8, %s35_s14  }
   0xd   : > { %s297_s21 = sshll.u32 %s98_s19, 6  ;;  %s519_s24 = scalar_lea.hbm %s598_s0, %s308_s20 }
   0xe   : > { %s102_s25 = scalar_lea.vmem [#allocation3], %s297_s21  ;;  %p523_p9 = pnand %p315_p8, %p499_p3 }
   0xf   : > { %s112_s26 = sshll.u32 %s102_s25, 4  ;;  %s529_s28 = scalar_lea.sflag [#allocation4], %s98_s19  ;;  %s527_s26 = int_to_ptr.vmem [resolvable:$true] %s112_s26 }
  0x10   : > { %s367_s29 = scalar_lea.hbm %s519_s24, 1024  ;;  %p369_p11 = pneg %p523_p9 }
  0x11   : > { %p368_p10 = scmp.ne.s32.totalorder %s519_s24, %s367_s29  ;;  %s372_s3 = scalar_lea.hbm %s598_s0, 2048 }
  0x12   : > { %p373_p0 = scmp.lt.u32.totalorder %s519_s24, %s598_s0  ;;  %p374_p1 = scmp.lt.u32.totalorder %s372_s3, %s367_s29 }
  0x13   : > { %p370_p12 = pnand %p369_p11, %p368_p10  ;;  %p376_p3 = scmp.lt.u32.totalorder %s367_s29, %s519_s24 }
  0x14   : > { %p375_p2 = por %p374_p1, %p373_p0 }
  0x15   : > { %p371_p13 = pneg %p370_p12 }
  0x16   : > { %p377_p4 = por %p376_p3, %p375_p2 }
  0x18   : > { %p378_p5 = pnand %p377_p4, %p371_p13 }
  0x1a   : > { %381 = shalt.err (!%p378_p5)
}
  0x1b   : > { %s382_s6 = scalar_lea.vmem %s527_s26, 1024  ;;  %s449_s12 = smov [#allocation3]  }
  0x1c   : > { %p383_p6 = scmp.ne.s32.totalorder %s527_s26, %s382_s6  ;;  %s387_s14 = sshll.u32 %s449_s12, 4  ;;  %s388_s14 = int_to_ptr.vmem [resolvable:$false] %s387_s14 }
  0x1d   : > { %s389_s15 = scalar_lea.vmem %s388_s14, 2048  ;;  %p390_p12 = scmp.lt.s32.totalorder %s527_s26, %s388_s14 }
  0x1e   : > { %p385_p8 = pnand %p383_p6, %p369_p11  ;;  %p391_p0 = scmp.lt.s32.totalorder %s389_s15, %s382_s6 }
  0x20   : > { %p386_p10 = pneg %p385_p8  ;;  %p392_p1 = por %p391_p0, %p390_p12 }
  0x22   : > { %p393_p2 = pnand %p392_p1, %p386_p10 }
  0x24   : > { %396 = shalt.err (!%p393_p2)
}
  0x25   : > { %s450_s16 = smov 256   ;;  %s451_s19 = smov 16  }
  0x26   : > { %314 = dma.hbm_to_vmem [thread:$0]  (!%p523_p9), %s519_s24, 1024, %s527_s26, %s529_s28, %s450_s16, %s450_s16, %s451_s19  }
  0x27   : > { %p301_p11 = scmp.ge.s32.totalorder %s447_s11, 1  ;;  %p120_p13 = scmp.lt.s32.totalorder %s447_s11, 3 }
  0x29   : > { %p121_p3 = pnand %p301_p11, %p120_p13 }
  0x2a   : > { %s126_s20 = sand.u32 (!%p121_p3), 1, %s431_s7  }
  0x2b   : > { %124 = sbr.rel (%p121_p3) target bundleno = 214 (0xd6), region = 24  ;;  %s302_s21 = sshll.u32 (!%p121_p3), %s126_s20, 6 }
  0x2c   : > { %s127_s22 = scalar_lea.sflag (!%p121_p3), [#allocation4], %s126_s20  ;;  %s130_s23 = scalar_lea.vmem (!%p121_p3), [#allocation3], %s302_s21 }
  0x32   : > { %422 = dma.done.wait (%p506_p7), %s127_s22, 1024  }
  0x33   : > { %424 = vsyncadd (%p506_p7), %s127_s22, 4294966272  ;;  %vm161_vm0 = vcmask 7168   ;;  %v452_v0 = vmov 0.0   ;;  %v166_v1 = vld [vmem:[%s130_s23] sm:$0xff]  ;;  %v167_v2 = vld [vmem:[%s130_s23 + $0x8] sm:$0xff]  ;;  %s303_s17 = sshll.u32 %s439_s9, 2 }
  0x34   : > { %162 = vst.msk [vmem:[#allocation2] sm:$0xff] %vm161_vm0, %v452_v0  ;;  %163 = vst.msk [vmem:[#allocation2 + $0x8] sm:$0xff] %vm161_vm0, %v452_v0  ;;  %v170_v3 = vld [vmem:[%s130_s23 + $0x20] sm:$0xff]  ;;  %v178_v4 = vadd.f32 %v167_v2, %v166_v1  ;;  %v171_v5 = vld [vmem:[%s130_s23 + $0x28] sm:$0xff]  ;;  %p152_p7 = scmp.lt.s32.totalorder %s303_s17, 7 }
  0x35   : > { %164 = vst.msk [vmem:[#allocation2 + $0x10] sm:$0xff] %vm161_vm0, %v452_v0  ;;  %165 = vst.msk [vmem:[#allocation2 + $0x18] sm:$0xff] %vm161_vm0, %v452_v0  ;;  %v168_v6 = vld [vmem:[%s130_s23 + $0x10] sm:$0xff]  ;;  %v169_v7 = vld [vmem:[%s130_s23 + $0x18] sm:$0xff]  ;;  %v184_v8 = vadd.f32 %v171_v5, %v170_v3 }
  0x36   : > { %v172_v9 = vld [vmem:[%s130_s23 + $0x30] sm:$0xff]  ;;  %v173_v10 = vld [vmem:[%s130_s23 + $0x38] sm:$0xff]  ;;  %179 = vadd.xlane.f32.xlu0 %v178_v4  ;;  %v181_v11 = vadd.f32 %v169_v7, %v168_v6  ;;  %s611_s17 = smov (!%p152_p7, %s303_s17), 7 }
  0x37   : > { %185 = vadd.xlane.f32.xlu1 %v184_v8  ;;  %v187_v12 = vadd.f32 %v173_v10, %v172_v9  ;;  %s304_s24 = sshll.u32 %s611_s17, 3 }
  0x38   : > { %s155_s26 = scalar_lea.vmem %s599_s1, %s304_s24 }
  0x3a   : > { %182 = vadd.xlane.f32.xlu0 %v181_v11 }
  0x3b   : > { %188 = vadd.xlane.f32.xlu1 %v187_v12  ;;  %v174_v13 = vld [vmem:[#allocation2] sm:$0xff]  ;;  %v175_v19 = vld [vmem:[#allocation2 + $0x8] sm:$0xff] }
  0x3c   : > { %v176_v14 = vld [vmem:[#allocation2 + $0x10] sm:$0xff]  ;;  %v177_v20 = vld [vmem:[#allocation2 + $0x18] sm:$0xff] }
  0xc3   : > { %v180_v15 = vpop.xlane.xlu0 %179 }
  0xc4   : > { %v190_v16 = vadd.f32 %v180_v15, %v174_v13  ;;  %v186_v17 = vpop.xlane.xlu1 %185 }
  0xc5   : > { %v192_v18 = vadd.f32 %v186_v17, %v176_v14 }
  0xc6   : > { %195 = vst.msk [vmem:[#allocation2] sm:$0xff] %vm161_vm0, %v190_v16 }
  0xc7   : > { %197 = vst.msk [vmem:[#allocation2 + $0x10] sm:$0xff] %vm161_vm0, %v192_v18  ;;  %v183_v21 = vpop.xlane.xlu0 %182 }
  0xc8   : > { %v191_v22 = vadd.f32 %v183_v21, %v175_v19  ;;  %v189_v23 = vpop.xlane.xlu1 %188 }
  0xc9   : > { %v193_v24 = vadd.f32 %v189_v23, %v177_v20 }
  0xca   : > { %196 = vst.msk [vmem:[#allocation2 + $0x8] sm:$0xff] %vm161_vm0, %v191_v22 }
  0xcb   : > { %198 = vst.msk [vmem:[#allocation2 + $0x18] sm:$0xff] %vm161_vm0, %v193_v24 }
  0xcd   : > { %v202_v25 = vld [vmem:[#allocation2] sm:$0xff] }
  0xce   : > { %v206_v26 = vmul.f32 0.00390625, %v202_v25  ;;  %v204_v27 = vld [vmem:[#allocation2 + $0x10] sm:$0xff] }
  0xcf   : > { %v208_v31 = vmul.f32 0.00390625, %v204_v27 }
  0xd0   : > { %210 = vst.msk [vmem:[%s155_s26] sm:$0xff] %vm161_vm0, %v206_v26 }
  0xd1   : > { %v203_v28 = vld [vmem:[#allocation2 + $0x8] sm:$0xff]  ;;  %212 = vst.msk [vmem:[%s155_s26 + $0x10] sm:$0xff] %vm161_vm0, %v208_v31 }
  0xd2   : > { %v207_v29 = vmul.f32 0.00390625, %v203_v28  ;;  %v205_v30 = vld [vmem:[#allocation2 + $0x18] sm:$0xff] }
  0xd3   : > { %v209_v32 = vmul.f32 0.00390625, %v205_v30 }
  0xd4   : > { %211 = vst.msk [vmem:[%s155_s26 + $0x8] sm:$0xff] %vm161_vm0, %v207_v29 }
  0xd5   : > { %213 = vst.msk [vmem:[%s155_s26 + $0x18] sm:$0xff] %vm161_vm0, %v209_v32 }
  0xd6 PF: > { %s14_s11 = sadd.s32 1, %s447_s11   ;;  %s603_s6 = smov %s431_s7 }
  0xd7   : > { %p11_p9 = scmp.ge.s32.totalorder %s14_s11, 4   ;;  %s604_s7 = smov %s435_s8 }
  0xd8   : > { %s605_s8 = smov %s512_s18  ;;  %s606_s9 = smov %s443_s10 }
  0xd9   : > { %s607_s10 = smov %s609_s13  ;;  %13 = sbr.rel (!%p11_p9) target bundleno = 4 (0x4), region = 72 }
  0xe0   :  { %236 = vsyncpa [#allocation4], 1 }
  0xe1   :  { %238 = vsyncpa [#allocation4 + $0x1], 1 }

</bundles_post_ra>
